<compile_context>
chip_gen: v7x
topology: tpu7x:2x2x1
jax: 0.10.0
libtpu: 0.0.40
codegen_flags: <defaults>
</compile_context>

<pallas_src>
import jax
import jax.numpy as jnp
from jax.experimental import pallas as pl
from jax.experimental.pallas import tpu as pltpu


_LANE = 512            # lane-dense last dim (multiple of 128)
_MAX_BLOCK_ROWS = 1024 # (1024, 512) f32 tile = 2 MiB/buffer; 4 buffers = 8 MiB


def _h_sigmoid_kernel(x_ref, o_ref):
    x = x_ref[...]
    dt = x.dtype
    three = jnp.asarray(3.0, dtype=dt)
    zero = jnp.asarray(0.0, dtype=dt)
    six = jnp.asarray(6.0, dtype=dt)
    inv_six = jnp.asarray(1.0 / 6.0, dtype=dt)
    # relu6(x + 3) / 6
    y = jnp.minimum(jnp.maximum(x + three, zero), six) * inv_six
    o_ref[...] = y.astype(o_ref.dtype)


def h_sigmoid(x):
    """h_sigmoid on a tensor of any shape via a tiled, pipelined Pallas TPU kernel."""
    orig_shape = x.shape
    orig_dtype = x.dtype
    n = int(x.size)

    # Flatten to a lane-dense 2D slab (rows, _LANE); pad the tail if needed.
    pad = (-n) % _LANE
    flat = x.reshape(-1)
    if pad:
        flat = jnp.pad(flat, (0, pad))
    rows = (n + pad) // _LANE
    x2d = flat.reshape(rows, _LANE)

    # Tile the row axis: full-extent block if small, else 1024-row blocks
    # (multiple of 8 sublanes; partial edge block handled by Pallas).
    block_rows = rows if rows <= _MAX_BLOCK_ROWS else _MAX_BLOCK_ROWS
    grid = (pl.cdiv(rows, block_rows),)

    out2d = pl.pallas_call(
        _h_sigmoid_kernel,
        out_shape=jax.ShapeDtypeStruct((rows, _LANE), orig_dtype),
        grid=grid,
        in_specs=[pl.BlockSpec((block_rows, _LANE), lambda i: (i, 0))],
        out_specs=pl.BlockSpec((block_rows, _LANE), lambda i: (i, 0)),
        compiler_params=pltpu.CompilerParams(
            dimension_semantics=("parallel",),
        ),
    )(x2d)

    out_flat = out2d.reshape(-1)
    if pad:
        out_flat = out_flat[:n]
    return out_flat.reshape(orig_shape)


def h_sigmoid_ref(x):
    # Pure-JAX reference for verification (in the input dtype).
    dt = x.dtype
    return jnp.minimum(jnp.maximum(x + jnp.asarray(3.0, dt), jnp.asarray(0.0, dt)),
                       jnp.asarray(6.0, dt)) * jnp.asarray(1.0 / 6.0, dt)


if __name__ == "__main__":
    key = jax.random.PRNGKey(0)
    k1, k2, k3 = jax.random.split(key, 3)

    # 1) Small NCHW input consistent with the module usage.
    x = jax.random.normal(k1, (2, 4, 16, 16), dtype=jnp.float32) * 4.0
    out = jax.block_until_ready(h_sigmoid(x))
    ref = h_sigmoid_ref(x)
    assert out.shape == x.shape and out.dtype == x.dtype
    assert float(jnp.max(jnp.abs(out - ref))) < 1e-6, "mismatch vs reference (small f32)"

    # 2) Odd-sized input (exercises the lane padding path).
    x_odd = jax.random.normal(k2, (2, 3, 7, 9), dtype=jnp.float32) * 4.0
    out_odd = jax.block_until_ready(h_sigmoid(x_odd))
    ref_odd = h_sigmoid_ref(x_odd)
    assert out_odd.shape == x_odd.shape
    assert float(jnp.max(jnp.abs(out_odd - ref_odd))) < 1e-6, "mismatch vs reference (odd f32)"

    # 3) Larger activation map (exercises the multi-tile pipelined grid) in bf16.
    x_big = (jax.random.normal(k3, (4, 96, 64, 64), dtype=jnp.float32) * 4.0).astype(jnp.bfloat16)
    out_big = jax.block_until_ready(h_sigmoid(x_big))
    ref_big = h_sigmoid_ref(x_big)
    assert out_big.shape == x_big.shape and out_big.dtype == jnp.bfloat16
    diff = jnp.max(jnp.abs(out_big.astype(jnp.float32) - ref_big.astype(jnp.float32)))
    assert float(diff) < 1e-2, "mismatch vs reference (big bf16)"

    print("KERNEL_OK")
</pallas_src>

<mosaic_0001>
module attributes {stable_mosaic.version = 11 : i64} {
  func.func @_h_sigmoid_kernel(%arg0: i32, %arg1: memref<4x512xf32, #tpu.memory_space<vmem>>, %arg2: memref<4x512xf32, #tpu.memory_space<vmem>>) attributes {dimension_semantics = [#tpu.dimension_semantics<parallel>], iteration_bounds = array<i64: 1>, scalar_prefetch = 0 : i64, scratch_operands = 0 : i64, tpu.core_type = #tpu.core_type<tc>, window_params = [{transform_indices = @transform_0, window_bounds = array<i64: 4, 512>}, {transform_indices = @transform_1, window_bounds = array<i64: 4, 512>}]} {
    %c0 = arith.constant 0 : index
    %c0_0 = arith.constant 0 : index
    %0 = vector.load %arg1[%c0, %c0_0] : memref<4x512xf32, #tpu.memory_space<vmem>>, vector<4x512xf32>
    %cst = arith.constant 3.000000e+00 : f32
    %1 = vector.broadcast %cst : f32 to vector<4x512xf32>
    %2 = arith.addf %0, %1 : vector<4x512xf32>
    %cst_1 = arith.constant 0.000000e+00 : f32
    %3 = vector.broadcast %cst_1 : f32 to vector<4x512xf32>
    %4 = arith.maximumf %2, %3 : vector<4x512xf32>
    %cst_2 = arith.constant 6.000000e+00 : f32
    %5 = vector.broadcast %cst_2 : f32 to vector<4x512xf32>
    %6 = arith.minimumf %4, %5 : vector<4x512xf32>
    %cst_3 = arith.constant 0.166666672 : f32
    %7 = vector.broadcast %cst_3 : f32 to vector<4x512xf32>
    %8 = arith.mulf %6, %7 : vector<4x512xf32>
    %c0_4 = arith.constant 0 : index
    %c0_5 = arith.constant 0 : index
    %9 = vector.load %arg2[%c0_4, %c0_5] : memref<4x512xf32, #tpu.memory_space<vmem>>, vector<4x512xf32>
    tpu.vector_store %arg2[%c0_4, %c0_5], %8 {strides = array<i32>} : memref<4x512xf32, #tpu.memory_space<vmem>>, vector<4x512xf32>,
    return
  }
  func.func @transform_0(%arg0: i32) -> (i32, i32) {
    %c0_i32 = arith.constant 0 : i32
    %c0_i32_0 = arith.constant 0 : i32
    return %arg0, %c0_i32 : i32, i32
  }
  func.func @transform_1(%arg0: i32) -> (i32, i32) {
    %c0_i32 = arith.constant 0 : i32
    %c0_i32_0 = arith.constant 0 : i32
    return %arg0, %c0_i32 : i32, i32
  }
}

</mosaic_0001>

<bundles_post_ra>
// kernel: tpu_custom_call.1
= control target key start
LH: loop header
LB: loop body
LE: loop exit
PB: predicated region body
PF: predicated region fallthrough
CT: control target
= control target key end

     0   :  { %6 = vsyncpa [#allocation3], 0  ;;  %s134_s0 = inlined_call_operand.hbm [shape: f32[4,512], index: 0, kind: input, shape index: {}]   ;;  %s135_s1 = inlined_call_operand.hbm [shape: f32[4,512], index: 1, kind: output, shape index: {}]  }
   0x1   :  { %7 = vsyncpa [#allocation4], 0  ;;  %s98_s6 = smov [#allocation2]   ;;  %s50_s10 = scalar_lea.hbm %s134_s0, 256 }
   0x2   :  { %s14_s7 = sshll.u32 %s98_s6, 4  ;;  %p51_p0 = scmp.ne.s32.totalorder %s134_s0, %s50_s10  ;;  %s15_s7 = int_to_ptr.vmem [resolvable:$true] %s14_s7 }
   0x3   :  { %p54_p1 = scmp.lt.u32.totalorder %s50_s10, %s134_s0 }
   0x5   :  { %p56_p2 = pnand %p54_p1, %p51_p0 }
   0x7   :  { %59 = shalt.err (!%p56_p2)
}
   0x8   :  { %s60_s15 = scalar_lea.vmem %s15_s7, 256  ;;  %p65_p4 = scmp.lt.s32.totalorder %s15_s7, %s15_s7 }
   0x9   :  { %p61_p3 = scmp.ne.s32.totalorder %s15_s7, %s60_s15  ;;  %p66_p5 = scmp.lt.s32.totalorder %s60_s15, %s60_s15 }
   0xb   :  { %p67_p6 = por %p66_p5, %p65_p4 }
   0xd   :  { %p68_p7 = pnand %p67_p6, %p61_p3 }
   0xf   :  { %71 = shalt.err (!%p68_p7)
}
  0x10   :  { %17 = dma.hbm_to_vmem [thread:$0]  %s134_s0, 256, %s15_s7, [#allocation3]  }
  0x11   :  { %94 = dma.done.wait [#allocation3], 256  }
  0x12   :  { %95 = vsyncadd [#allocation3], 4294967040  ;;  %v21_v0 = vld [vmem:[#allocation2] sm:$0xff]  ;;  %v22_v1 = vld [vmem:[#allocation2 + $0x8] sm:$0xff]  ;;  %s99_s18 = smov [#allocation5]  }
  0x13   :  { %v23_v2 = vadd.f32 3.0, %v21_v0  ;;  %v24_v3 = vadd.f32 3.0, %v22_v1  ;;  %s39_s19 = sshll.u32 %s99_s18, 4  ;;  %s40_s19 = int_to_ptr.vmem [resolvable:$true] %s39_s19 }
  0x14   :  { %s72_s20 = scalar_lea.vmem %s40_s19, 256  ;;  %p77_p9 = scmp.lt.s32.totalorder %s40_s19, %s40_s19 }
  0x15   :  { %v25_v4 = vmax.f32 %v23_v2, 0.0  ;;  %v26_v5 = vmax.f32 %v24_v3, 0.0  ;;  %p73_p8 = scmp.ne.s32.totalorder %s40_s19, %s72_s20  ;;  %p78_p10 = scmp.lt.s32.totalorder %s72_s20, %s72_s20 }
  0x17   :  { %v27_v6 = vmin.f32 %v25_v4, 6.0  ;;  %v28_v7 = vmin.f32 %v26_v5, 6.0  ;;  %p79_p11 = por %p78_p10, %p77_p9 }
  0x19   :  { %v29_v8 = vmul.f32 0.16666667, %v27_v6  ;;  %v30_v9 = vmul.f32 0.16666667, %v28_v7  ;;  %p80_p12 = pnand %p79_p11, %p73_p8 }
  0x1b   :  { %31 = vst [vmem:[#allocation5] sm:$0xff] %v29_v8  ;;  %32 = vst [vmem:[#allocation5 + $0x8] sm:$0xff] %v30_v9 }
  0x1c   :  { %83 = shalt.err (!%p80_p12)
}
  0x1d   :  { %s84_s22 = scalar_lea.hbm %s135_s1, 256 }
  0x1e   :  { %p85_p13 = scmp.ne.s32.totalorder %s135_s1, %s84_s22  ;;  %p88_p0 = scmp.lt.u32.totalorder %s84_s22, %s135_s1 }
  0x20   :  { %p90_p1 = pnand %p88_p0, %p85_p13 }
  0x22   :  { %93 = shalt.err (!%p90_p1)
}
  0x23   :  { %42 = dma.vmem_to_hbm [thread:$0]  %s40_s19, 256, %s135_s1, [#allocation4]  }
  0x24   :  { %96 = dma.done.wait [#allocation4], 256  }
  0x25   :  { %97 = vsyncadd [#allocation4], 4294967040 }
  0x26   :  { %46 = vsyncpa [#allocation3], 1 }
  0x27   :  { %47 = vsyncpa [#allocation4], 1 }

</bundles_post_ra>
